<compile_context>
chip_gen: v7x
topology: tpu7x:2x2x1
jax: 0.10.0
libtpu: 0.0.40
codegen_flags: <defaults>
</compile_context>

<pallas_src>
import functools
import math

import jax
import jax.numpy as jnp
from jax.experimental import pallas as pl
from jax.experimental.pallas import tpu as pltpu


def _dspike_kernel(x_ref, o_ref, *, temp, inv_denom, region):
    # Read in the original dtype, do the math in f32, write back in the
    # original dtype — no wrapper-level casts (no extra HBM passes).
    x = x_ref[...].astype(jnp.float32)
    out_bp = jnp.tanh(temp * jnp.clip(x, -region, region)) * inv_denom + 0.5
    out_s = (x >= 0).astype(jnp.float32)
    # Keep the detach-trick arithmetic to mirror the module's forward exactly
    # (value == out_s up to fp rounding); stop_gradient only affects autodiff.
    o_ref[...] = ((out_s - out_bp) + out_bp).astype(o_ref.dtype)


def _pick_block_rows(rows, lane_w, itemsize):
    """Row-block size: ~1 MiB input tile, multiple of 8, >=2 grid steps when possible."""
    if rows < 16:
        # Cannot split into two multiple-of-8 blocks -> single full-extent block
        # (full array dim is always a legal BlockSpec dim).
        return rows
    # ~1 MiB per input tile => ~4 MiB with in+out double-buffered.
    target = max(8, ((1 << 20) // (lane_w * max(itemsize, 1))) // 8 * 8)
    # Keep at least 2 grid steps so the parallel axis can shard across
    # v7x's two TensorCores.
    half = (rows // 2) // 8 * 8
    return max(8, min(target, half))


def dspike_forward(x, temp, region=1.0):
    """Pallas TPU implementation of DSPIKE.forward(x, temp)."""
    orig_shape = x.shape
    dtype = x.dtype
    n = x.size

    temp_f = float(temp)
    region_f = float(region)
    inv_denom = 1.0 / (2.0 * math.tanh(region_f * temp_f))
    # TODO(synk): if `temp` must vary at runtime without recompiles, pass it via
    # an SMEM scalar instead of baking it in as a closure constant.

    # Widest lane-dense last dim (multiple of 128) that divides n -> no pad copy.
    lane_w = None
    for w in (1024, 512, 256, 128):
        if n % w == 0:
            lane_w = w
            break

    xf = x.reshape(-1)
    padded = False
    if lane_w is None:
        # Rare fallback: ragged element count — pad to a multiple of 128.
        lane_w = 128
        n_pad = pl.cdiv(n, lane_w) * lane_w
        xf = jnp.pad(xf, (0, n_pad - n))
        padded = True

    x2 = xf.reshape(-1, lane_w)  # lane-dense 2-D slab (sublane x lane layout)
    rows = x2.shape[0]

    block_rows = _pick_block_rows(rows, lane_w, dtype.itemsize)
    grid = (pl.cdiv(rows, block_rows),)  # ragged last block is masked by Pallas;
                                         # elementwise, so garbage-in/masked-out is safe.

    kernel = functools.partial(
        _dspike_kernel, temp=temp_f, inv_denom=inv_denom, region=region_f)

    out2 = pl.pallas_call(
        kernel,
        out_shape=jax.ShapeDtypeStruct(x2.shape, dtype),
        grid=grid,
        in_specs=[pl.BlockSpec((block_rows, lane_w), lambda i: (i, 0))],
        out_specs=pl.BlockSpec((block_rows, lane_w), lambda i: (i, 0)),
        compiler_params=pltpu.CompilerParams(
            dimension_semantics=("parallel",)),
    )(x2)

    out = out2.reshape(-1)
    if padded:
        out = out[:n]
    return out.reshape(orig_shape)


def dspike_reference(x, temp, region=1.0):
    """Pure-JAX reference mirroring the PyTorch forward."""
    xf = x.astype(jnp.float32)
    out_bp = (jnp.tanh(temp * jnp.clip(xf, -region, region))
              / (2.0 * math.tanh(region * temp)) + 0.5)
    out_s = (xf >= 0).astype(jnp.float32)
    return ((out_s - out_bp) + out_bp).astype(x.dtype)


if __name__ == "__main__":
    key = jax.random.PRNGKey(0)
    # NCHW input, small shapes: batch=2, channels=4, spatial=16x16
    x = jax.random.normal(key, (2, 4, 16, 16), dtype=jnp.float32) * 2.0
    temp = 3.0      # temperature scalar, as in DSPIKE.forward(x, temp)
    region = 1.0    # module default

    out = dspike_forward(x, temp, region)
    out = jax.block_until_ready(out)

    ref = dspike_reference(x, temp, region)
    assert out.shape == x.shape and out.dtype == x.dtype
    assert jnp.allclose(out, ref, atol=1e-6, rtol=1e-6)

    print("KERNEL_OK")
</pallas_src>

<mosaic_0001>
module attributes {stable_mosaic.version = 11 : i64} {
  func.func @_dspike_kernel(%arg0: i32, %arg1: memref<2x1024xf32, #tpu.memory_space<vmem>>, %arg2: memref<2x1024xf32, #tpu.memory_space<vmem>>) attributes {dimension_semantics = [#tpu.dimension_semantics<parallel>], iteration_bounds = array<i64: 1>, scalar_prefetch = 0 : i64, scratch_operands = 0 : i64, tpu.core_type = #tpu.core_type<tc>, window_params = [{transform_indices = @transform_0, window_bounds = array<i64: 2, 1024>}, {transform_indices = @transform_1, window_bounds = array<i64: 2, 1024>}]} {
    %c0 = arith.constant 0 : index
    %c0_0 = arith.constant 0 : index
    %0 = vector.load %arg1[%c0, %c0_0] : memref<2x1024xf32, #tpu.memory_space<vmem>>, vector<2x1024xf32>
    %cst = arith.constant -1.000000e+00 : f32
    %cst_1 = arith.constant 1.000000e+00 : f32
    %1 = vector.broadcast %cst : f32 to vector<2x1024xf32>
    %2 = arith.maximumf %1, %0 : vector<2x1024xf32>
    %3 = vector.broadcast %cst_1 : f32 to vector<2x1024xf32>
    %4 = arith.minimumf %3, %2 : vector<2x1024xf32>
    %cst_2 = arith.constant 3.000000e+00 : f32
    %5 = vector.broadcast %cst_2 : f32 to vector<2x1024xf32>
    %6 = arith.mulf %5, %4 : vector<2x1024xf32>
    %7 = math.tanh %6 : vector<2x1024xf32>
    %cst_3 = arith.constant 0.502484918 : f32
    %8 = vector.broadcast %cst_3 : f32 to vector<2x1024xf32>
    %9 = arith.mulf %7, %8 : vector<2x1024xf32>
    %cst_4 = arith.constant 5.000000e-01 : f32
    %10 = vector.broadcast %cst_4 : f32 to vector<2x1024xf32>
    %11 = arith.addf %9, %10 : vector<2x1024xf32>
    %cst_5 = arith.constant 0.000000e+00 : f32
    %12 = vector.broadcast %cst_5 : f32 to vector<2x1024xf32>
    %13 = arith.cmpf oge, %0, %12 : vector<2x1024xf32>
    %14 = arith.extui %13 : vector<2x1024xi1> to vector<2x1024xi32>
    %15 = arith.sitofp %14 : vector<2x1024xi32> to vector<2x1024xf32>
    %16 = arith.subf %15, %11 : vector<2x1024xf32>
    %17 = arith.addf %16, %11 : vector<2x1024xf32>
    %c0_6 = arith.constant 0 : index
    %c0_7 = arith.constant 0 : index
    %18 = vector.load %arg2[%c0_6, %c0_7] : memref<2x1024xf32, #tpu.memory_space<vmem>>, vector<2x1024xf32>
    tpu.vector_store %arg2[%c0_6, %c0_7], %17 {strides = array<i32>} : memref<2x1024xf32, #tpu.memory_space<vmem>>, vector<2x1024xf32>,
    return
  }
  func.func @transform_0(%arg0: i32) -> (i32, i32) {
    %c0_i32 = arith.constant 0 : i32
    %c0_i32_0 = arith.constant 0 : i32
    return %arg0, %c0_i32 : i32, i32
  }
  func.func @transform_1(%arg0: i32) -> (i32, i32) {
    %c0_i32 = arith.constant 0 : i32
    %c0_i32_0 = arith.constant 0 : i32
    return %arg0, %c0_i32 : i32, i32
  }
}

</mosaic_0001>

<bundles_post_ra>
// kernel: tpu_custom_call.1
= control target key start
LH: loop header
LB: loop body
LE: loop exit
PB: predicated region body
PF: predicated region fallthrough
CT: control target
= control target key end

     0   :  { %6 = vsyncpa [#allocation3], 0  ;;  %s158_s0 = inlined_call_operand.hbm [shape: f32[2,1024], index: 0, kind: input, shape index: {}]   ;;  %s159_s1 = inlined_call_operand.hbm [shape: f32[2,1024], index: 1, kind: output, shape index: {}]  }
   0x1   :  { %7 = vsyncpa [#allocation4], 0  ;;  %s121_s6 = smov [#allocation2]   ;;  %s73_s10 = scalar_lea.hbm %s158_s0, 256 }
   0x2   :  { %s14_s7 = sshll.u32 %s121_s6, 4  ;;  %p74_p0 = scmp.ne.s32.totalorder %s158_s0, %s73_s10  ;;  %s15_s7 = int_to_ptr.vmem [resolvable:$true] %s14_s7 }
   0x3   :  { %p77_p1 = scmp.lt.u32.totalorder %s73_s10, %s158_s0 }
   0x5   :  { %p79_p2 = pnand %p77_p1, %p74_p0 }
   0x7   :  { %82 = shalt.err (!%p79_p2)
}
   0x8   :  { %s83_s15 = scalar_lea.vmem %s15_s7, 256  ;;  %p88_p4 = scmp.lt.s32.totalorder %s15_s7, %s15_s7 }
   0x9   :  { %p84_p3 = scmp.ne.s32.totalorder %s15_s7, %s83_s15  ;;  %p89_p5 = scmp.lt.s32.totalorder %s83_s15, %s83_s15 }
   0xb   :  { %p90_p6 = por %p89_p5, %p88_p4 }
   0xd   :  { %p91_p7 = pnand %p90_p6, %p84_p3 }
   0xf   :  { %94 = shalt.err (!%p91_p7)
}
  0x10   :  { %17 = dma.hbm_to_vmem [thread:$0]  %s158_s0, 256, %s15_s7, [#allocation3]  }
  0x11   :  { %117 = dma.done.wait [#allocation3], 256  }
  0x12   :  { %118 = vsyncadd [#allocation3], 4294967040  ;;  %v21_v0 = vld [vmem:[#allocation2] sm:$0xff]  ;;  %v22_v1 = vld [vmem:[#allocation2 + $0x8] sm:$0xff]  ;;  %v122_v9 = vmov 0.0   ;;  %s123_s0 = smov [#allocation5]  }
  0x13   :  { %v62_v2 = vclamps-f32 %v21_v0, 1.0  ;;  %v63_v3 = vclamps-f32 %v22_v1, 1.0  ;;  %vm35_vm0 = vcmp.ge.f32.partialorder %v21_v0, 0.0  ;;  %vm36_vm1 = vcmp.ge.f32.partialorder %v22_v1, 0.0  ;;  %s53_s18 = sshll.u32 %s123_s0, 4  ;;  %s54_s18 = int_to_ptr.vmem [resolvable:$true] %s53_s18 }
  0x14   :  { %v64_v10 = vsel %vm35_vm0, 1.0, %v122_v9  ;;  %v65_v13 = vsel %vm36_vm1, 1.0, %v122_v9  ;;  %s95_s19 = scalar_lea.vmem %s54_s18, 256  ;;  %p100_p9 = scmp.lt.s32.totalorder %s54_s18, %s54_s18 }
  0x15   :  { %v27_v4 = vmul.f32 3.0, %v62_v2  ;;  %v28_v5 = vmul.f32 3.0, %v63_v3  ;;  %p96_p8 = scmp.ne.s32.totalorder %s54_s18, %s95_s19  ;;  %p101_p10 = scmp.lt.s32.totalorder %s95_s19, %s95_s19 }
  0x17   :  { %69 = vtanh.f32 %v27_v4  ;;  %p102_p11 = por %p101_p10, %p100_p9 }
  0x18   :  { %71 = vtanh.f32 %v28_v5 }
  0x19   :  { %p103_p12 = pnand %p102_p11, %p96_p8 }
  0x21   :  { %v70_v6 = vpop.eup %69 }
  0x22   :  { %v72_v7 = vpop.eup %71  ;;  %v31_v8 = vmul.f32 0.5024849, %v70_v6 }
  0x23   :  { %v32_v11 = vmul.f32 0.5024849, %v72_v7 }
  0x24   :  { %v33_v12 = vadd.f32 0.5, %v31_v8 }
  0x25   :  { %v34_v14 = vadd.f32 0.5, %v32_v11 }
  0x26   :  { %v41_v15 = vsub.f32 %v64_v10, %v33_v12 }
  0x27   :  { %v42_v16 = vsub.f32 %v65_v13, %v34_v14 }
  0x28   :  { %v43_v17 = vadd.f32 %v41_v15, %v33_v12 }
  0x29   :  { %v44_v18 = vadd.f32 %v42_v16, %v34_v14 }
  0x2a   :  { %45 = vst [vmem:[#allocation5] sm:$0xff] %v43_v17 }
  0x2b   :  { %46 = vst [vmem:[#allocation5 + $0x8] sm:$0xff] %v44_v18 }
  0x2c   :  { %106 = shalt.err (!%p103_p12)
}
  0x2d   :  { %s107_s22 = scalar_lea.hbm %s159_s1, 256 }
  0x2e   :  { %p108_p13 = scmp.ne.s32.totalorder %s159_s1, %s107_s22  ;;  %p111_p0 = scmp.lt.u32.totalorder %s107_s22, %s159_s1 }
  0x30   :  { %p113_p1 = pnand %p111_p0, %p108_p13 }
  0x32   :  { %116 = shalt.err (!%p113_p1)
}
  0x33   :  { %56 = dma.vmem_to_hbm [thread:$0]  %s54_s18, 256, %s159_s1, [#allocation4]  }
  0x34   :  { %119 = dma.done.wait [#allocation4], 256  }
  0x35   :  { %120 = vsyncadd [#allocation4], 4294967040 }
  0x36   :  { %60 = vsyncpa [#allocation3], 1 }
  0x37   :  { %61 = vsyncpa [#allocation4], 1 }

</bundles_post_ra>
